<compile_context>
chip_gen: v6e
topology: v6e:2x2x1
jax: 0.10.0
libtpu: 0.0.40
codegen_flags: <defaults>
</compile_context>

<pallas_src>
import functools

import jax
import jax.numpy as jnp
from jax.experimental import pallas as pl
from jax.experimental.pallas import tpu as pltpu


def _partial_sqdiff_kernel(pred_ref, gt_ref, out_ref, *, row_tile, total_rows,
                           need_mask):
    """One row-block: partial sum((pred - gt)^2) -> scalar SMEM output block."""
    d = pred_ref[...].astype(jnp.float32) - gt_ref[...].astype(jnp.float32)
    if need_mask:
        i = pl.program_id(0)
        is_tail = i == pl.num_programs(0) - 1

        def _masked(dd):
            row_ids = jax.lax.broadcasted_iota(jnp.int32, dd.shape, 0) + i * row_tile
            dd = jnp.where(row_ids < total_rows, dd, jnp.float32(0.0))
            return jnp.sum(dd * dd)

        def _full(dd):
            return jnp.sum(dd * dd)

        out_ref[0, 0] = jax.lax.cond(is_tail, _masked, _full, d)
    else:
        out_ref[0, 0] = jnp.sum(d * d)


_TINY_BYTES = 512 * 1024


@functools.lru_cache(maxsize=1)
def _auto_tuning():
    """Returns (per-input block bytes, scoped-VMEM limit bytes) for this chip."""
    try:
        vmem_cap = int(pltpu.get_tpu_info().vmem_capacity_bytes)
    except Exception:  # conservative fallback if the query is unavailable
        vmem_cap = 128 * 1024 * 1024
    if vmem_cap <= 64 * 1024 * 1024:
        # v7x-class: huge HBM BW -> bigger blocks amortize per-step overhead;
        # only 64 MiB physical VMEM -> ~7 MiB/input, scoped limit 40 MiB.
        return 7 * 1024 * 1024, 40 * 1024 * 1024
    # v5e/v6e: 128 MiB physical; 4 MiB/input keeps step overhead ~6% while the
    # 2 inputs x 2 buffers footprint (16 MiB) needs the limit raised above
    # v5e's 16 MiB scoped default.
    return 4 * 1024 * 1024, 28 * 1024 * 1024


def joints_mse_loss_pallas(output, target, target_weight=None, *,
                           target_block_bytes=None):
    """0.5 * mean((output - target)^2), matching the reference joints_mse_loss."""
    del target_weight  # Reference joints_mse_loss never applies target_weight.
    b, j, h, w = output.shape
    rows = b * j
    cols = h * w
    inv_scale = 0.5 / float(rows * cols)

    pred2d = output.reshape(rows, cols)   # native dtype (bf16 stays bf16)
    gt2d = target.reshape(rows, cols)

    itemsize = max(jnp.dtype(output.dtype).itemsize,
                   jnp.dtype(target.dtype).itemsize)
    auto_block_bytes, vmem_limit = _auto_tuning()
    block_bytes = auto_block_bytes if target_block_bytes is None else target_block_bytes

    # Row alignment matching the packed sublane tile: 8 rows for 32-bit,
    # 16 for bf16, 32 for 8-bit dtypes (keeps DMA/layout unmasked).
    row_align = 8 * max(1, 4 // itemsize)

    bytes_per_row = cols * itemsize
    row_tile = max(row_align,
                   (block_bytes // max(bytes_per_row, 1)) // row_align * row_align)

    if row_tile >= rows:
        if rows * bytes_per_row <= _TINY_BYTES or rows < 2 * row_align:
            # Genuinely tiny: one full-array block, one DMA, no pipeline.
            row_tile = rows
        else:
            # Medium input: split ~in half so both v7x TensorCores get a block.
            half = (rows + 1) // 2
            row_tile = min(rows, -(-half // row_align) * row_align)
    num_blocks = pl.cdiv(rows, row_tile)
    need_mask = (rows % row_tile) != 0
    # TODO(synk): pathological shapes (rows <= row_align with enormous H*W)
    # would need an additional column-tiling path to keep a block inside VMEM.
    # TODO(synk): if H*W is small or not a multiple of 128, a lane-dense
    # re-view of the flat buffer would give unmasked full-width vector loads.

    # Keep the scoped-VMEM limit comfortably above the 2-input x 2-buffer
    # pipeline footprint (matters when callers hand-tune target_block_bytes).
    block_bytes_actual = row_tile * cols * itemsize
    vmem_limit = max(vmem_limit, 4 * block_bytes_actual + 4 * 1024 * 1024)

    kernel = functools.partial(
        _partial_sqdiff_kernel,
        row_tile=row_tile,
        total_rows=rows,
        need_mask=need_mask,
    )

    partials = pl.pallas_call(
        kernel,
        out_shape=jax.ShapeDtypeStruct((num_blocks, 1), jnp.float32),
        grid_spec=pltpu.PrefetchScalarGridSpec(
            num_scalar_prefetch=0,
            grid=(num_blocks,),
            in_specs=[
                pl.BlockSpec((row_tile, cols), lambda i: (i, 0)),
                pl.BlockSpec((row_tile, cols), lambda i: (i, 0)),
            ],
            out_specs=pl.BlockSpec((1, 1), lambda i: (i, 0),
                                   memory_space=pltpu.SMEM),
        ),
        compiler_params=pltpu.CompilerParams(
            dimension_semantics=("parallel",),
            vmem_limit_bytes=int(vmem_limit),
        ),
    )(pred2d, gt2d)

    # Tiny final reduction over per-block partials (done in XLA); keeps the
    # grid axis parallel (v7x megacore) and avoids a serialized running scalar.
    return jnp.sum(partials) * jnp.float32(inv_scale)


class JointsMSELossPallas:
    """JAX/Pallas port of JointsMSELoss.

    Note: the reference PyTorch `joints_mse_loss` accepts `target_weight` but
    never applies it (even when use_target_weight=True), so this port
    intentionally ignores it as well to match the reference forward exactly.
    """

    def __init__(self, use_target_weight=True):
        self.use_target_weight = use_target_weight

    def __call__(self, output, target, target_weight=None):
        if not self.use_target_weight:
            target_weight = None
        return joints_mse_loss_pallas(output, target, target_weight)


if __name__ == "__main__":
    key = jax.random.PRNGKey(0)
    k1, k2, k3 = jax.random.split(key, 3)

    # Small NCHW heatmaps (tiny single-block fast path).
    B, J, H, W = 2, 4, 16, 16
    output = jax.random.normal(k1, (B, J, H, W), dtype=jnp.float32)
    target = jax.random.normal(k2, (B, J, H, W), dtype=jnp.float32)
    target_weight = jax.random.uniform(k3, (B, J, 1), dtype=jnp.float32)

    loss_fn = JointsMSELossPallas(use_target_weight=True)
    loss = jax.block_until_ready(loss_fn(output, target, target_weight))
    ref = 0.5 * jnp.mean((output - target) ** 2)
    assert jnp.allclose(loss, ref, rtol=1e-5, atol=1e-6), (loss, ref)

    # Multi-block + masked ragged-tail path: force a small block size
    # (rows=24, row_tile=16 -> 2 blocks, tail block masked via lax.cond).
    B2, J2, H2, W2 = 3, 8, 16, 16
    k4, k5, k6 = jax.random.split(k3, 3)
    out2 = jax.random.normal(k4, (B2, J2, H2, W2), dtype=jnp.float32)
    tgt2 = jax.random.normal(k5, (B2, J2, H2, W2), dtype=jnp.float32)
    loss2 = jax.block_until_ready(
        joints_mse_loss_pallas(out2, tgt2, target_block_bytes=16 * H2 * W2 * 4))
    ref2 = 0.5 * jnp.mean((out2 - tgt2) ** 2)
    assert jnp.allclose(loss2, ref2, rtol=1e-5, atol=1e-6), (loss2, ref2)

    # bf16 heatmaps at native width + the auto "split into >=2 blocks so both
    # v7x TensorCores get work" path (rows=102 > tiny threshold in bf16,
    # row_tile rounded to the 16-row bf16 packing multiple, masked tail).
    B3, J3, H3, W3 = 6, 17, 64, 48
    k7, k8 = jax.random.split(k6)
    out3 = jax.random.normal(k7, (B3, J3, H3, W3), dtype=jnp.float32).astype(jnp.bfloat16)
    tgt3 = jax.random.normal(k8, (B3, J3, H3, W3), dtype=jnp.float32).astype(jnp.bfloat16)
    loss3 = jax.block_until_ready(joints_mse_loss_pallas(out3, tgt3))
    d3 = out3.astype(jnp.float32) - tgt3.astype(jnp.float32)
    ref3 = 0.5 * jnp.mean(d3 * d3)
    assert jnp.allclose(loss3, ref3, rtol=1e-4, atol=1e-6), (loss3, ref3)

    print("KERNEL_OK")
</pallas_src>

<mosaic_0001>
module attributes {stable_mosaic.version = 11 : i64} {
  func.func @_partial_sqdiff_kernel(%arg0: i32, %arg1: memref<8x256xf32, #tpu.memory_space<vmem>>, %arg2: memref<8x256xf32, #tpu.memory_space<vmem>>, %arg3: memref<1x1xf32, #tpu.memory_space<smem>>) attributes {dimension_semantics = [#tpu.dimension_semantics<parallel>], iteration_bounds = array<i64: 1>, scalar_prefetch = 0 : i64, scratch_operands = 0 : i64, tpu.core_type = #tpu.core_type<tc>, window_params = [{transform_indices = @transform_0, window_bounds = array<i64: 8, 256>}, {transform_indices = @transform_1, window_bounds = array<i64: 8, 256>}, {transform_indices = @transform_2, window_bounds = array<i64: 1, 1>}]} {
    %c0 = arith.constant 0 : index
    %c0_0 = arith.constant 0 : index
    %0 = vector.load %arg1[%c0, %c0_0] : memref<8x256xf32, #tpu.memory_space<vmem>>, vector<8x256xf32>
    %c0_1 = arith.constant 0 : index
    %c0_2 = arith.constant 0 : index
    %1 = vector.load %arg2[%c0_1, %c0_2] : memref<8x256xf32, #tpu.memory_space<vmem>>, vector<8x256xf32>
    %2 = arith.subf %0, %1 : vector<8x256xf32>
    %3 = arith.mulf %2, %2 : vector<8x256xf32>
    %4 = vector.shape_cast %3 : vector<8x256xf32> to vector<1x8x256xf32>
    %cst = arith.constant dense<0.000000e+00> : vector<1xf32>
    %5 = vector.multi_reduction <add>, %4, %cst [1, 2] : vector<1x8x256xf32> to vector<1xf32>
    %6 = vector.shape_cast %5 : vector<1xf32> to vector<1x1x1xf32>
    %7 = vector.extract %6[0, 0, 0] : f32 from vector<1x1x1xf32>
    %c0_3 = arith.constant 0 : index
    %c0_4 = arith.constant 0 : index
    %8 = memref.load %arg3[%c0_3, %c0_4] : memref<1x1xf32, #tpu.memory_space<smem>>
    memref.store %7, %arg3[%c0_3, %c0_4] : memref<1x1xf32, #tpu.memory_space<smem>>
    return
  }
  func.func @transform_0(%arg0: i32) -> (i32, i32) {
    %c0_i32 = arith.constant 0 : i32
    %c0_i32_0 = arith.constant 0 : i32
    return %arg0, %c0_i32 : i32, i32
  }
  func.func @transform_1(%arg0: i32) -> (i32, i32) {
    %c0_i32 = arith.constant 0 : i32
    %c0_i32_0 = arith.constant 0 : i32
    return %arg0, %c0_i32 : i32, i32
  }
  func.func @transform_2(%arg0: i32) -> (i32, i32) {
    %c0_i32 = arith.constant 0 : i32
    %c0_i32_0 = arith.constant 0 : i32
    return %arg0, %c0_i32 : i32, i32
  }
}

</mosaic_0001>

<bundles_post_ra>
// kernel: tpu_custom_call.1
= control target key start
LH: loop header
LB: loop body
LE: loop exit
PB: predicated region body
PF: predicated region fallthrough
CT: control target
= control target key end

     0   :  { %7 = vsyncpa [#allocation3], 0  ;;  %s157_s0 = inlined_call_operand.hbm [shape: f32[8,256], index: 0, kind: input, shape index: {}]   ;;  %s158_s1 = inlined_call_operand.hbm [shape: f32[8,256], index: 1, kind: input, shape index: {}]   ;;  %s159_s2 = inlined_call_operand.hbm [shape: f32[1,1], index: 2, kind: output, shape index: {}]  }
   0x1   :  { %8 = vsyncpa [#allocation6], 0 }
   0x2   :  { %9 = vsyncpa [#allocation4], 0  ;;  %s130_s9 = smov [#allocation2]   ;;  %s131_s11 = smov [#allocation5]  }
   0x3   :  { %s16_s10 = sshll.u32 %s130_s9, 4  ;;  %s26_s12 = sshll.u32 %s131_s11, 4  ;;  %s17_s10 = int_to_ptr.vmem [resolvable:$true] %s16_s10  ;;  %s27_s12 = int_to_ptr.vmem [resolvable:$true] %s26_s12 }
   0x4   :  { %s84_s13 = scalar_lea.vmem %s17_s10, 256  ;;  %p89_p1 = scmp.lt.s32.totalorder %s17_s10, %s17_s10 }
   0x5   :  { %p85_p0 = scmp.ne.s32.totalorder %s17_s10, %s84_s13  ;;  %p90_p2 = scmp.lt.s32.totalorder %s84_s13, %s84_s13 }
   0x7   :  { %p91_p3 = por %p90_p2, %p89_p1 }
   0x9   :  { %p92_p4 = pnand %p91_p3, %p85_p0 }
   0xb   :  { %95 = shalt.err (!%p92_p4)
}
   0xc   :  { %19 = dma.hbm_to_vmem [thread:$0]  %s157_s0, 256, %s17_s10, [#allocation3]  }
   0xd   :  { %s104_s16 = scalar_lea.vmem %s27_s12, 256  ;;  %p109_p6 = scmp.lt.s32.totalorder %s27_s12, %s27_s12 }
   0xe   :  { %p105_p5 = scmp.ne.s32.totalorder %s27_s12, %s104_s16  ;;  %p110_p7 = scmp.lt.s32.totalorder %s104_s16, %s104_s16 }
  0x10   :  { %p111_p8 = por %p110_p7, %p109_p6 }
  0x12   :  { %p112_p9 = pnand %p111_p8, %p105_p5 }
  0x14   :  { %115 = shalt.err (!%p112_p9)
}
  0x15   :  { %29 = dma.hbm_to_vmem [thread:$0]  %s158_s1, 256, %s27_s12, [#allocation6]  }
  0x16   :  { %124 = dma.done.wait [#allocation3], 256  }
  0x17   :  { %125 = vsyncadd [#allocation3], 4294967040 }
  0x18   :  { %126 = dma.done.wait [#allocation6], 256  }
  0x19   :  { %127 = vsyncadd [#allocation6], 4294967040  ;;  %v36_v0 = vld [vmem:[#allocation2] sm:$0xff]  ;;  %v37_v1 = vld [vmem:[#allocation2 + $0x8] sm:$0xff]  ;;  %s132_s1 = smov [#allocation7]  }
  0x1a   :  { %v38_v2 = vld [vmem:[#allocation5] sm:$0xff]  ;;  %v39_v3 = vld [vmem:[#allocation5 + $0x8] sm:$0xff] }
  0x1b   :  { %v40_v4 = vsub.f32 %v36_v0, %v38_v2  ;;  %v41_v5 = vsub.f32 %v37_v1, %v39_v3 }
  0x1d   :  { %v42_v6 = vmul.f32 %v40_v4, %v40_v4  ;;  %v43_v7 = vmul.f32 %v41_v5, %v41_v5 }
  0x1f   :  { %v44_v8 = vadd.f32 %v43_v7, %v42_v6 }
  0x21   :  { %45 = vadd.xlane.f32.xlu0 %v44_v8 }
  0xaa   :  { %v46_v9 = vpop.xlane.xlu0 %45 }
  0xab   :  { %v47_v10 = vrot.slane %v46_v9, 4 }
  0xad   :  { %v48_v11 = vadd.f32 %v47_v10, %v46_v9 }
  0xaf   :  { %v49_v12 = vrot.slane %v48_v11, 2 }
  0xb1   :  { %v50_v13 = vadd.f32 %v49_v12, %v48_v11 }
  0xb3   :  { %v51_v14 = vrot.slane %v50_v13, 1 }
  0xb5   :  { %v52_v15 = vadd.f32 %v51_v14, %v50_v13 }
  0xb7   :  { %71 = vpush %v52_v15 }
  0xe8   :  { %s72_s0 = spop %71 }
  0xe9   :  { %55 = sst [smem:[#allocation7]] %s72_s0 }
  0xea   :  { %63 = dma.smem_to_hbm %s132_s1, 16, %s159_s2, [#allocation4]  }
  0xeb   :  { %128 = dma.done.wait [#allocation4], 16  }
  0xec   :  { %129 = vsyncadd [#allocation4], 4294967280 }
  0xed   :  { %67 = sfence }
  0xee   :  { %68 = vsyncpa [#allocation3], 1 }
  0xef   :  { %69 = vsyncpa [#allocation6], 1 }
  0xf0   :  { %70 = vsyncpa [#allocation4], 1 }

</bundles_post_ra>
